<compile_context>
chip_gen: v5e
topology: v5e:2x2
jax: 0.10.0
libtpu: 0.0.40
codegen_flags: <defaults>
</compile_context>

<pallas_src>
import functools

import jax
import jax.numpy as jnp
from jax.experimental import pallas as pl
from jax.experimental.pallas import tpu as pltpu


# ---------------------------------------------------------------------------
# Kernel
# ---------------------------------------------------------------------------
def regression_train_kernel(x_ref, ts_ref,
                            w1_ref, b1_ref, w2_ref, b2_ref,
                            wt_ref, bt_ref,
                            out_ref, *, cast_lhs):
    """One (core-slice, batch-tile) grid step.

    grid = (core_slices, batch_steps): axis 0 is "parallel" (v7x 2-TC split),
    axis 1 is the "arbitrary" batch reduction.  The f32 output block (8, F)
    stays resident across axis 1 and is used directly as the accumulator of
    per-column squared-error sums (no scratch, no per-step finalize matmul).
    """

    @pl.when(pl.program_id(1) == 0)
    def _init():
        out_ref[...] = jnp.zeros_like(out_ref)

    def mm(a_f32, w_ref):
        # Weights are bf16.  On chips with a bf16 VPU (v6e/v7x) cast the f32
        # activations down for the MXU; on v5e the pack sweep costs more than
        # the MXU time it saves, so keep the LHS in f32 and upcast the weights.
        if cast_lhs:
            return jnp.dot(a_f32.astype(w_ref.dtype), w_ref[...],
                           preferred_element_type=jnp.float32)
        return jnp.dot(a_f32, w_ref[...].astype(jnp.float32),
                       preferred_element_type=jnp.float32)

    # Shared trunk: two Linear+ReLU layers (bias add / ReLU in f32).
    h = jnp.dot(x_ref[...], w1_ref[...], preferred_element_type=jnp.float32)
    h = jnp.maximum(h + b1_ref[...], 0.0)
    h = jnp.maximum(mm(h, w2_ref) + b2_ref[...], 0.0)

    # All task heads fused into one lane-dense (TB, n_tasks*D_out) MXU matmul.
    y = mm(h, wt_ref) + bt_ref[...]

    # Per-column sum of squared errors for this batch tile; accumulate into the
    # resident output block (broadcast over the 8 sublanes -> dense stores).
    d = y - ts_ref[...]
    out_ref[...] += jnp.sum(d * d, axis=0, keepdims=True)


# ---------------------------------------------------------------------------
# Wrapper-side policy helpers
# ---------------------------------------------------------------------------
def _device_kind():
    try:
        return jax.devices()[0].device_kind.lower()
    except Exception:
        return ""


def _default_cast_lhs(kind=None):
    kind = _device_kind() if kind is None else kind
    # v5e has no bf16 VPU: in-kernel bf16 packing of activations is overhead.
    return not any(tag in kind for tag in ("v5 lite", "v5e", "v5lite"))


def _core_slices(kind=None):
    kind = _device_kind() if kind is None else kind
    # v7x has 2 TensorCores per chip; split the batch reduction across them.
    return 2 if "v7" in kind else 1


def _vmem_limit_bytes():
    try:
        cap = int(pltpu.get_tpu_info().vmem_capacity_bytes)
    except Exception:
        cap = 64 * 1024 * 1024  # conservative (v7x per-TC VMEM)
    return max(32 * 1024 * 1024, min(96 * 1024 * 1024, (cap * 3) // 4))


def _batch_tile_cap(d_in, hidden, F, x_bytes, vmem_limit):
    # Per-batch-row footprint: double-buffered x/ts streams + f32 h/y/diff
    # temporaries.  Keep streams+temps under ~1/4 of the scoped VMEM limit.
    # 512 is the vreg-pressure-safe ceiling with f32 intermediates.
    per_row = 2 * (d_in * x_bytes + F * 4) + (2 * hidden + 2 * F) * 4
    cap = (vmem_limit // 4) // max(per_row, 1)
    cap = max(8, (cap // 8) * 8)
    return min(512, cap)


def _choose_partition(B, tile_cap, cores_hint):
    """Pick (core_slices, batch_tile) such that tb % 8 == 0 or tb == B."""
    for nc in ([cores_hint, 1] if cores_hint > 1 else [1]):
        if B % nc:
            continue
        bc = B // nc
        if bc <= tile_cap and (nc == 1 or bc % 8 == 0):
            return nc, bc
        tiles = [t for t in range(8, min(tile_cap, bc) + 1, 8) if bc % t == 0]
        if tiles:
            return nc, max(tiles)
    # TODO(synk): masked tail tile for ragged batches that do not tile cleanly;
    # fall back to a single full-batch tile (may exceed the VMEM-derived cap).
    return 1, B


# ---------------------------------------------------------------------------
# Forward
# ---------------------------------------------------------------------------
def regression_train_forward(x, ts, params, *, matmul_dtype=jnp.bfloat16,
                             tb=None, cast_lhs=None, core_slices=None):
    """Pallas forward: returns task_loss of shape (n_tasks,), float32."""
    B, d_in = x.shape
    _, n_tasks, d_out = ts.shape
    hidden = params["w1"].shape[1]
    F = n_tasks * d_out

    kind = _device_kind()
    if cast_lhs is None:
        cast_lhs = _default_cast_lhs(kind)
    if core_slices is None:
        core_slices = _core_slices(kind)

    vmem_limit = _vmem_limit_bytes()
    tile_cap = _batch_tile_cap(d_in, hidden, F,
                               jnp.dtype(matmul_dtype).itemsize, vmem_limit)
    if tb is None:
        nc, tb = _choose_partition(B, tile_cap, core_slices)
    else:
        nc = core_slices if (core_slices > 1 and B % (core_slices * tb) == 0) else 1
    assert B % (nc * tb) == 0, "batch must tile evenly"  # TODO(synk): ragged tail
    steps = B // (nc * tb)

    # One-time wrapper-side layout plumbing (outside the kernel):
    #   fuse the n_tasks head weights/biases into one lane-dense (H, F) slab and
    #   flatten ts to (B, F) so the whole head stage is a single MXU matmul.
    wt_fused = jnp.transpose(params["wt"], (1, 0, 2)).reshape(hidden, F)
    bt_fused = params["bt"].reshape(1, F)
    ts_flat = ts.reshape(B, F).astype(jnp.float32)

    # bf16 only on the MXU operands; biases / targets stay f32.
    x_c = x.astype(matmul_dtype)
    w1_c = params["w1"].astype(matmul_dtype)
    w2_c = params["w2"].astype(matmul_dtype)
    wt_c = wt_fused.astype(matmul_dtype)
    b1 = params["b1"].astype(jnp.float32)
    b2 = params["b2"].astype(jnp.float32)
    bt = bt_fused.astype(jnp.float32)

    kern = functools.partial(regression_train_kernel, cast_lhs=cast_lhs)

    stream = lambda c, i: (c * steps + i, 0)   # streamed x / ts batch tiles
    const = lambda c, i: (0, 0)                # resident weights / biases

    def resident_spec(shape):
        # Loop-invariant operands: single-buffer (drop the dead 2nd VMEM copy).
        try:
            return pl.BlockSpec(shape, const, pipeline_mode=pl.Buffered(1))
        except Exception:
            return pl.BlockSpec(shape, const)

    grid_spec = pltpu.PrefetchScalarGridSpec(
        num_scalar_prefetch=0,
        grid=(nc, steps),
        in_specs=[
            pl.BlockSpec((tb, d_in), stream),   # x tile (bf16)
            pl.BlockSpec((tb, F), stream),      # ts tile (f32, lane-dense)
            resident_spec((d_in, hidden)),      # w1
            resident_spec((1, hidden)),         # b1
            resident_spec((hidden, hidden)),    # w2
            resident_spec((1, hidden)),         # b2
            resident_spec((hidden, F)),         # wt fused
            resident_spec((1, F)),              # bt fused
        ],
        # One (8, F) f32 slab per core slice, used as the reduction accumulator.
        out_specs=pl.BlockSpec((8, F), lambda c, i: (c, 0)),
    )

    out = pl.pallas_call(
        kern,
        out_shape=jax.ShapeDtypeStruct((nc * 8, F), jnp.float32),
        grid_spec=grid_spec,
        compiler_params=pltpu.CompilerParams(
            dimension_semantics=("parallel", "arbitrary"),
            vmem_limit_bytes=vmem_limit,
        ),
    )(x_c, ts_flat, w1_c, b1, w2_c, b2, wt_c, bt)

    # Each 8-row slab holds identical per-core column sums of squared errors.
    # Tiny finalize (per-task segment sum + mean) lives in the wrapper.
    col_sums = out.reshape(nc, 8, F)[:, 0, :].sum(axis=0)            # (F,)
    inv_count = 1.0 / float(B * d_out)
    return col_sums.reshape(n_tasks, d_out).sum(axis=-1) * inv_count


# ---------------------------------------------------------------------------
# Params / reference
# ---------------------------------------------------------------------------
def init_params(key, d_in, hidden, n_tasks, d_out):
    ks = jax.random.split(key, 6)
    scale = 0.1
    return {
        "w1": scale * jax.random.normal(ks[0], (d_in, hidden), jnp.float32),
        "b1": scale * jax.random.normal(ks[1], (1, hidden), jnp.float32),
        "w2": scale * jax.random.normal(ks[2], (hidden, hidden), jnp.float32),
        "b2": scale * jax.random.normal(ks[3], (1, hidden), jnp.float32),
        "wt": scale * jax.random.normal(ks[4], (n_tasks, hidden, d_out), jnp.float32),
        "bt": scale * jax.random.normal(ks[5], (n_tasks, 1, d_out), jnp.float32),
        # GradNorm task-weighting parameter (unused in forward, kept for parity).
        "weights": jnp.ones((n_tasks,), jnp.float32),
    }


def reference_forward(x, ts, params, *, matmul_dtype=jnp.float32, cast_lhs=True):
    """Pure-JAX reference mirroring the kernel's precision policy."""
    md = matmul_dtype

    def mm(a, w, cast_a):
        wq = w.astype(md)
        if cast_a:
            return jnp.dot(a.astype(md), wq, preferred_element_type=jnp.float32)
        return jnp.dot(a, wq.astype(jnp.float32), preferred_element_type=jnp.float32)

    h = jnp.maximum(mm(x, params["w1"], True) + params["b1"], 0.0)
    h = jnp.maximum(mm(h, params["w2"], cast_lhs) + params["b2"], 0.0)
    losses = []
    for i in range(ts.shape[1]):
        y_i = mm(h, params["wt"][i], cast_lhs) + params["bt"][i]
        losses.append(jnp.mean((y_i - ts[:, i, :]) ** 2))
    return jnp.stack(losses)


if __name__ == "__main__":
    B, D_IN, HIDDEN, N_TASKS, D_OUT = 8, 32, 64, 3, 16

    key = jax.random.PRNGKey(0)
    k_x, k_t, k_p = jax.random.split(key, 3)
    x = jax.random.normal(k_x, (B, D_IN), jnp.float32)
    ts = jax.random.normal(k_t, (B, N_TASKS, D_OUT), jnp.float32)
    params = init_params(k_p, D_IN, HIDDEN, N_TASKS, D_OUT)

    task_loss = regression_train_forward(x, ts, params)
    task_loss = jax.block_until_ready(task_loss)
    assert task_loss.shape == (N_TASKS,)

    # Tight check against a reference using the kernel's exact precision policy.
    ref_matched = reference_forward(x, ts, params, matmul_dtype=jnp.bfloat16,
                                    cast_lhs=_default_cast_lhs())
    assert jnp.allclose(task_loss, ref_matched, rtol=1e-3, atol=1e-3), (task_loss, ref_matched)

    # Loose sanity check against the pure-f32 PyTorch-equivalent math.
    ref_f32 = reference_forward(x, ts, params, matmul_dtype=jnp.float32)
    assert jnp.allclose(task_loss, ref_f32, rtol=5e-2, atol=5e-2), (task_loss, ref_f32)

    print("KERNEL_OK")
</pallas_src>

<mosaic_0001>
module attributes {stable_mosaic.version = 11 : i64} {
  func.func @regression_train_kernel(%arg0: i32, %arg1: i32, %arg2: memref<8x32xbf16, #tpu.memory_space<vmem>>, %arg3: memref<8x48xf32, #tpu.memory_space<vmem>>, %arg4: memref<32x64xbf16, #tpu.memory_space<vmem>>, %arg5: memref<1x64xf32, #tpu.memory_space<vmem>>, %arg6: memref<64x64xbf16, #tpu.memory_space<vmem>>, %arg7: memref<1x64xf32, #tpu.memory_space<vmem>>, %arg8: memref<64x48xbf16, #tpu.memory_space<vmem>>, %arg9: memref<1x48xf32, #tpu.memory_space<vmem>>, %arg10: memref<8x48xf32, #tpu.memory_space<vmem>>) attributes {dimension_semantics = [#tpu.dimension_semantics<parallel>, #tpu.dimension_semantics<arbitrary>], iteration_bounds = array<i64: 1, 1>, scalar_prefetch = 0 : i64, scratch_operands = 0 : i64, tpu.core_type = #tpu.core_type<tc>, window_params = [{transform_indices = @transform_0, window_bounds = array<i64: 8, 32>}, {transform_indices = @transform_1, window_bounds = array<i64: 8, 48>}, {pipeline_mode = #tpu.pipeline_mode<synchronous>, transform_indices = @transform_2, window_bounds = array<i64: 32, 64>}, {pipeline_mode = #tpu.pipeline_mode<synchronous>, transform_indices = @transform_3, window_bounds = array<i64: 1, 64>}, {pipeline_mode = #tpu.pipeline_mode<synchronous>, transform_indices = @transform_4, window_bounds = array<i64: 64, 64>}, {pipeline_mode = #tpu.pipeline_mode<synchronous>, transform_indices = @transform_5, window_bounds = array<i64: 1, 64>}, {pipeline_mode = #tpu.pipeline_mode<synchronous>, transform_indices = @transform_6, window_bounds = array<i64: 64, 48>}, {pipeline_mode = #tpu.pipeline_mode<synchronous>, transform_indices = @transform_7, window_bounds = array<i64: 1, 48>}, {transform_indices = @transform_8, window_bounds = array<i64: 8, 48>}]} {
    %c0_i32 = arith.constant 0 : i32
    %0 = arith.cmpi eq, %arg1, %c0_i32 : i32
    %1 = arith.extui %0 : i1 to i32
    %c0_i32_0 = arith.constant 0 : i32
    %2 = arith.cmpi ne, %1, %c0_i32_0 : i32
    scf.if %2 {
      %cst_25 = arith.constant 0.000000e+00 : f32
      %34 = vector.broadcast %cst_25 : f32 to vector<8x48xf32>
      %c0_26 = arith.constant 0 : index
      %c0_27 = arith.constant 0 : index
      %35 = vector.load %arg10[%c0_26, %c0_27] : memref<8x48xf32, #tpu.memory_space<vmem>>, vector<8x48xf32>
      tpu.vector_store %arg10[%c0_26, %c0_27], %34 {strides = array<i32>} : memref<8x48xf32, #tpu.memory_space<vmem>>, vector<8x48xf32>,
    } else {
    }
    %c0 = arith.constant 0 : index
    %c0_1 = arith.constant 0 : index
    %3 = vector.load %arg2[%c0, %c0_1] : memref<8x32xbf16, #tpu.memory_space<vmem>>, vector<8x32xbf16>
    %c0_2 = arith.constant 0 : index
    %c0_3 = arith.constant 0 : index
    %4 = vector.load %arg4[%c0_2, %c0_3] : memref<32x64xbf16, #tpu.memory_space<vmem>>, vector<32x64xbf16>
    %cst = arith.constant dense<0.000000e+00> : vector<8x64xf32>
    %5 = tpu.matmul %3, %4, %cst {dimension_numbers = #tpu.dot_dimension_numbers<[1], [0], [0], [1], [0, 0, 1, 1], [], []>} : vector<8x32xbf16>, vector<32x64xbf16>, vector<8x64xf32> -> vector<8x64xf32>
    %c0_4 = arith.constant 0 : index
    %c0_5 = arith.constant 0 : index
    %6 = vector.load %arg5[%c0_4, %c0_5] : memref<1x64xf32, #tpu.memory_space<vmem>>, vector<1x64xf32>
    %7 = vector.broadcast %6 : vector<1x64xf32> to vector<8x64xf32>
    %8 = arith.addf %5, %7 : vector<8x64xf32>
    %cst_6 = arith.constant 0.000000e+00 : f32
    %9 = vector.broadcast %cst_6 : f32 to vector<8x64xf32>
    %10 = arith.maximumf %8, %9 : vector<8x64xf32>
    %11 = arith.truncf %10 : vector<8x64xf32> to vector<8x64xbf16>
    %c0_7 = arith.constant 0 : index
    %c0_8 = arith.constant 0 : index
    %12 = vector.load %arg6[%c0_7, %c0_8] : memref<64x64xbf16, #tpu.memory_space<vmem>>, vector<64x64xbf16>
    %cst_9 = arith.constant dense<0.000000e+00> : vector<8x64xf32>
    %13 = tpu.matmul %11, %12, %cst_9 {dimension_numbers = #tpu.dot_dimension_numbers<[1], [0], [0], [1], [0, 0, 1, 1], [], []>} : vector<8x64xbf16>, vector<64x64xbf16>, vector<8x64xf32> -> vector<8x64xf32>
    %c0_10 = arith.constant 0 : index
    %c0_11 = arith.constant 0 : index
    %14 = vector.load %arg7[%c0_10, %c0_11] : memref<1x64xf32, #tpu.memory_space<vmem>>, vector<1x64xf32>
    %15 = vector.broadcast %14 : vector<1x64xf32> to vector<8x64xf32>
    %16 = arith.addf %13, %15 : vector<8x64xf32>
    %cst_12 = arith.constant 0.000000e+00 : f32
    %17 = vector.broadcast %cst_12 : f32 to vector<8x64xf32>
    %18 = arith.maximumf %16, %17 : vector<8x64xf32>
    %19 = arith.truncf %18 : vector<8x64xf32> to vector<8x64xbf16>
    %c0_13 = arith.constant 0 : index
    %c0_14 = arith.constant 0 : index
    %20 = vector.load %arg8[%c0_13, %c0_14] : memref<64x48xbf16, #tpu.memory_space<vmem>>, vector<64x48xbf16>
    %cst_15 = arith.constant dense<0.000000e+00> : vector<8x48xf32>
    %21 = tpu.matmul %19, %20, %cst_15 {dimension_numbers = #tpu.dot_dimension_numbers<[1], [0], [0], [1], [0, 0, 1, 1], [], []>} : vector<8x64xbf16>, vector<64x48xbf16>, vector<8x48xf32> -> vector<8x48xf32>
    %c0_16 = arith.constant 0 : index
    %c0_17 = arith.constant 0 : index
    %22 = vector.load %arg9[%c0_16, %c0_17] : memref<1x48xf32, #tpu.memory_space<vmem>>, vector<1x48xf32>
    %23 = vector.broadcast %22 : vector<1x48xf32> to vector<8x48xf32>
    %24 = arith.addf %21, %23 : vector<8x48xf32>
    %c0_18 = arith.constant 0 : index
    %c0_19 = arith.constant 0 : index
    %25 = vector.load %arg3[%c0_18, %c0_19] : memref<8x48xf32, #tpu.memory_space<vmem>>, vector<8x48xf32>
    %26 = arith.subf %24, %25 : vector<8x48xf32>
    %c0_20 = arith.constant 0 : index
    %c0_21 = arith.constant 0 : index
    %27 = vector.load %arg10[%c0_20, %c0_21] : memref<8x48xf32, #tpu.memory_space<vmem>>, vector<8x48xf32>
    %28 = arith.mulf %26, %26 : vector<8x48xf32>
    %cst_22 = arith.constant dense<0.000000e+00> : vector<48xf32>
    %29 = vector.multi_reduction <add>, %28, %cst_22 [0] : vector<8x48xf32> to vector<48xf32>
    %30 = vector.shape_cast %29 : vector<48xf32> to vector<1x48xf32>
    %31 = vector.broadcast %30 : vector<1x48xf32> to vector<8x48xf32>
    %32 = arith.addf %27, %31 : vector<8x48xf32>
    %c0_23 = arith.constant 0 : index
    %c0_24 = arith.constant 0 : index
    %33 = vector.load %arg10[%c0_23, %c0_24] : memref<8x48xf32, #tpu.memory_space<vmem>>, vector<8x48xf32>
    tpu.vector_store %arg10[%c0_23, %c0_24], %32 {strides = array<i32>} : memref<8x48xf32, #tpu.memory_space<vmem>>, vector<8x48xf32>,
    return
  }
  func.func @transform_0(%arg0: i32, %arg1: i32) -> (i32, i32) {
    %c1_i32 = arith.constant 1 : i32
    %0 = arith.muli %arg0, %c1_i32 : i32
    %1 = arith.addi %0, %arg1 : i32
    %c0_i32 = arith.constant 0 : i32
    %c0_i32_0 = arith.constant 0 : i32
    return %1, %c0_i32 : i32, i32
  }
  func.func @transform_1(%arg0: i32, %arg1: i32) -> (i32, i32) {
    %c1_i32 = arith.constant 1 : i32
    %0 = arith.muli %arg0, %c1_i32 : i32
    %1 = arith.addi %0, %arg1 : i32
    %c0_i32 = arith.constant 0 : i32
    %c0_i32_0 = arith.constant 0 : i32
    return %1, %c0_i32 : i32, i32
  }
  func.func @transform_2(%arg0: i32, %arg1: i32) -> (i32, i32) {
    %c0_i32 = arith.constant 0 : i32
    %c0_i32_0 = arith.constant 0 : i32
    %c0_i32_1 = arith.constant 0 : i32
    return %c0_i32, %c0_i32_0 : i32, i32
  }
  func.func @transform_3(%arg0: i32, %arg1: i32) -> (i32, i32) {
    %c0_i32 = arith.constant 0 : i32
    %c0_i32_0 = arith.constant 0 : i32
    %c0_i32_1 = arith.constant 0 : i32
    return %c0_i32, %c0_i32_0 : i32, i32
  }
  func.func @transform_4(%arg0: i32, %arg1: i32) -> (i32, i32) {
    %c0_i32 = arith.constant 0 : i32
    %c0_i32_0 = arith.constant 0 : i32
    %c0_i32_1 = arith.constant 0 : i32
    return %c0_i32, %c0_i32_0 : i32, i32
  }
  func.func @transform_5(%arg0: i32, %arg1: i32) -> (i32, i32) {
    %c0_i32 = arith.constant 0 : i32
    %c0_i32_0 = arith.constant 0 : i32
    %c0_i32_1 = arith.constant 0 : i32
    return %c0_i32, %c0_i32_0 : i32, i32
  }
  func.func @transform_6(%arg0: i32, %arg1: i32) -> (i32, i32) {
    %c0_i32 = arith.constant 0 : i32
    %c0_i32_0 = arith.constant 0 : i32
    %c0_i32_1 = arith.constant 0 : i32
    return %c0_i32, %c0_i32_0 : i32, i32
  }
  func.func @transform_7(%arg0: i32, %arg1: i32) -> (i32, i32) {
    %c0_i32 = arith.constant 0 : i32
    %c0_i32_0 = arith.constant 0 : i32
    %c0_i32_1 = arith.constant 0 : i32
    return %c0_i32, %c0_i32_0 : i32, i32
  }
  func.func @transform_8(%arg0: i32, %arg1: i32) -> (i32, i32) {
    %c0_i32 = arith.constant 0 : i32
    %c0_i32_0 = arith.constant 0 : i32
    return %arg0, %c0_i32 : i32, i32
  }
}

</mosaic_0001>

<bundles_post_ra>
// kernel: tpu_custom_call.1
= control target key start
LH: loop header
LB: loop body
LE: loop exit
PB: predicated region body
PF: predicated region fallthrough
CT: control target
= control target key end

     0   :  { %13 = vsyncpa [#allocation3], 0  ;;  %s468_s0 = inlined_call_operand.hbm [shape: bf16[8,32], index: 0, kind: input, shape index: {}]   ;;  %s469_s1 = inlined_call_operand.vmem [shape: f32[8,48], index: 1, kind: input, shape index: {}]   ;;  %s470_s2 = inlined_call_operand.vmem [shape: bf16[32,64], index: 2, kind: input, shape index: {}]   ;;  %s471_s3 = inlined_call_operand.vmem [shape: f32[1,64], index: 3, kind: input, shape index: {}]   ;;  %s472_s4 = inlined_call_operand.vmem [shape: bf16[64,64], index: 4, kind: input, shape index: {}]   ;;  %s473_s5 = inlined_call_operand.vmem [shape: f32[1,64], index: 5, kind: input, shape index: {}]   ;;  %s474_s6 = inlined_call_operand.vmem [shape: bf16[64,48], index: 6, kind: input, shape index: {}]   ;;  %s475_s7 = inlined_call_operand.vmem [shape: f32[1,48], index: 7, kind: input, shape index: {}]   ;;  %s476_s8 = inlined_call_operand.hbm [shape: f32[8,48], index: 8, kind: output, shape index: {}]  }
   0x1   :  { %14 = vsyncpa [#allocation4], 0  ;;  %s23_s29 = sshll.u32 %s468_s0, 4  ;;  %s367_s30 = smov [#allocation2]   ;;  %s24_s29 = int_to_ptr.hbm [resolvable:$true] %s23_s29 }
   0x2   :  { %s25_s9 = sshll.u32 %s367_s30, 4  ;;  %s26_s9 = int_to_ptr.vmem [resolvable:$true] %s25_s9 }
   0x3   :  { %28 = dma.hbm_to_vmem [thread:$0]  %s24_s29, 64, %s26_s9, [#allocation3]  }
   0x4   :  { %363 = dma.done.wait [#allocation3], 64  }
   0x5   :  { %364 = vsyncadd [#allocation3], 4294967232  ;;  %v300_v0 = vld [vmem:[%s470_s2 + $0x8] sm:$0xff]  ;;  %v304_v1 = vld [vmem:[%s472_s4 + $0x18] sm:$0xff]  ;;  %vm93_vm0 = vcmask 261120   ;;  %vm148_vm1 = vcmask 523264  }
   0x6   :  { %103 = vmatpush.bf16.msra.mxu0 %v300_v0  ;;  %v299_v2 = vld [vmem:[%s470_s2] sm:$0xff]  ;;  %156 = vmatpush.bf16.msra.mxu1 %v304_v1  ;;  %v303_v3 = vld [vmem:[%s472_s4 + $0x10] sm:$0xff]  ;;  %v302_v5 = vld [vmem:[%s472_s4 + $0x8] sm:$0xff]  ;;  %vm70_vm2 = vcmask 392192   ;;  %v368_v17 = vmov 0.0   ;;  %s240_s13 = sshll.u32 %s476_s8, 4  ;;  %s241_s13 = int_to_ptr.hbm [resolvable:$true] %s240_s13 }
   0x7   :  { %v72_v4 = vld [vmem:[#allocation2] sm:$0xf]  ;;  %v308_v7 = vld [vmem:[%s474_s6 + $0x18] sm:$0xff]  ;;  %v307_v8 = vld [vmem:[%s474_s6 + $0x10] sm:$0xff]  ;;  %71 = vst.msk [vmem:[#allocation5] sm:$0xff] %vm70_vm2, %v368_v17 }
   0x8   :  { %v301_v6 = vld [vmem:[%s472_s4] sm:$0xff]  ;;  %210 = vmatpush.bf16.msra.mxu2 %v308_v7  ;;  %v306_v15 = vld [vmem:[%s474_s6 + $0x8] sm:$0xff] }
   0x9   :  { %v312_v9 = vld [vmem:[%s471_s3] ss:$0 sm:$0xff] }
   0xa   :  { %104 = vmatpush.bf16.msra.mxu0 %v299_v2  ;;  %157 = vmatpush.bf16.msra.mxu1 %v303_v3  ;;  %v305_v16 = vld [vmem:[%s474_s6] sm:$0xff] }
   0xb   :  { %v313_v18 = vld [vmem:[%s473_s5] ss:$0 sm:$0xff]  ;;  %s369_s5 = smov [#allocation5]  }
   0xc   :  { %211 = vmatpush.bf16.msra.mxu2 %v307_v8  ;;  %v314_v24 = vld [vmem:[%s475_s7] ss:$0 sm:$0xff]  ;;  %s238_s11 = sshll.u32 %s369_s5, 4  ;;  %s239_s11 = int_to_ptr.vmem [resolvable:$true] %s238_s11 }
   0xd   :  { %264 = vmatmul.msk.bf16.vlgmr.msra.gmra.mxu0 %vm93_vm0, %v72_v4  ;;  %v219_v26 = vld [vmem:[%s469_s1] sm:$0xff] }
   0xe   :  { %158 = vmatpush.bf16.msra.mxu1 %v302_v5  ;;  %v221_v37 = vld [vmem:[#allocation5] sm:$0xff] }
  0x10   :  { %212 = vmatpush.bf16.msra.mxu2 %v306_v15 }
  0x12   :  { %159 = vmatpush.bf16.msra.mxu1 %v301_v6 }
  0x14   :  { %213 = vmatpush.bf16.msra.mxu2 %v305_v16 }
  0x8a   :  { %v106_v10 = vpop.f32.mrf.mxu0 }
  0x8b   :  { %v107_v11 = vadd.f32 %v312_v9, %v106_v10 }
  0x8d   :  { %v110_v12 = vmax.f32 %v107_v11, 0.0 }
  0x8f   :  { %v111_v13 = vpack.c.bf16 %v110_v12, %v110_v12 }
  0x91   :  { %281 = vmatmul.msk.bf16.vlgmr.msra.gmra.mxu1 %vm148_vm1, %v111_v13 }
  0x92   :  { %v108_v14 = vpop.f32.mrf.mxu0 }
 0x10e   :  { %v161_v19 = vpop.f32.mrf.mxu1 }
 0x10f   :  { %v162_v20 = vadd.f32 %v313_v18, %v161_v19 }
 0x111   :  { %v165_v21 = vmax.f32 %v162_v20, 0.0 }
 0x113   :  { %v166_v22 = vpack.c.bf16 %v165_v21, %v165_v21 }
 0x115   :  { %298 = vmatmul.msk.bf16.vlgmr.msra.gmra.mxu2 %vm148_vm1, %v166_v22 }
 0x116   :  { %v163_v23 = vpop.f32.mrf.mxu1 }
 0x198   :  { %v215_v25 = vpop.f32.mrf.mxu2 }
 0x199   :  { %v216_v27 = vadd.f32 %v314_v24, %v215_v25 }
 0x19b   :  { %v220_v28 = vsub.f32 %v216_v27, %v219_v26 }
 0x19d   :  { %v222_v29 = vmul.f32 %v220_v28, %v220_v28 }
 0x19f   :  { %v224_v30 = vsel %vm70_vm2, %v222_v29, 0.0 }
 0x1a0   :  { %v225_v31 = vrot.slane %v224_v30, 4  ;;  %v217_v32 = vpop.f32.mrf.mxu2 }
 0x1a2   :  { %v226_v33 = vadd.f32 %v225_v31, %v224_v30 }
 0x1a4   :  { %v227_v34 = vrot.slane %v226_v33, 2 }
 0x1a6   :  { %v228_v35 = vadd.f32 %v227_v34, %v226_v33 }
 0x1a8   :  { %v229_v36 = vrot.slane %v228_v35, 1 }
 0x1aa   :  { %v230_v38 = vadd.f32 %v229_v36, %v228_v35 }
 0x1ac   :  { %v231_v39 = vadd.f32 %v230_v38, %v221_v37 }
 0x1ae   :  { %232 = vst.msk [vmem:[#allocation5] sm:$0xff] %vm70_vm2, %v231_v39 }
 0x1af   :  { %243 = dma.vmem_to_hbm [thread:$0]  %s239_s11, 128, %s241_s13, [#allocation4]  }
 0x1b0   :  { %365 = dma.done.wait [#allocation4], 128  }
 0x1b1   :  { %366 = vsyncadd [#allocation4], 4294967168 }
 0x1b2   :  { %248 = vsyncpa [#allocation3], 1 }
 0x1b3   :  { %249 = vsyncpa [#allocation4], 1 }

</bundles_post_ra>
